<compile_context>
chip_gen: v7x
topology: tpu7x:2x2x1
jax: 0.10.0
libtpu: 0.0.40
codegen_flags: <defaults>
</compile_context>

<pallas_src>
import math

import jax
import jax.numpy as jnp
from jax.experimental import pallas as pl
from jax.experimental.pallas import tpu as pltpu

_LOG_2PI = math.log(2.0 * math.pi)


def _pushed_gaussian_kernel(loc_ref, pre_scale_ref, eps_ref,
                            v_ref, r_ref, lp_ref):
    loc = loc_ref[...]              # (3, 1)  — xyz on sublanes
    pre_scale = pre_scale_ref[...]  # (3, 1)
    eps = eps_ref[...]              # (3, T)  — batch on lanes

    # (1) softplus, numerically stable: log(1 + exp(x)) = logaddexp(x, 0)
    scale = jnp.logaddexp(pre_scale, 0.0)      # (3, 1)
    log_scale = jnp.log(scale)                 # (3, 1)

    # (2) reparameterized Gaussian sample in the so(3) algebra
    v = loc + scale * eps                      # (3, T), lane-broadcast params
    v_ref[...] = v

    x = v[0:1, :]
    y = v[1:2, :]
    z = v[2:3, :]

    xx = x * x
    yy = y * y
    zz = z * z
    xy = x * y
    xz = x * z
    yz = y * z

    theta_sq = xx + yy + zz
    theta = jnp.sqrt(theta_sq)

    # Rodrigues coefficients.  b via the cancellation-free half-angle form
    # 2*sin(t/2)^2 / t^2; Taylor fallback below 1e-3 (covers the f32
    # cancellation band and theta == 0).
    small = theta < 1e-3
    safe_t = jnp.where(small, 1.0, theta)
    safe_t2 = jnp.where(small, 1.0, theta_sq)
    sin_t = jnp.sin(safe_t)
    sin_h = jnp.sin(0.5 * safe_t)
    a = jnp.where(small, 1.0 - theta_sq * (1.0 / 6.0), sin_t / safe_t)
    b = jnp.where(small, 0.5 - theta_sq * (1.0 / 24.0),
                  2.0 * sin_h * sin_h / safe_t2)

    # (3) R = I + a*K + b*K^2, K = hat(v); one full-lane store per matrix entry.
    r_ref[0:1, :] = 1.0 - b * (yy + zz)
    r_ref[1:2, :] = b * xy - a * z
    r_ref[2:3, :] = b * xz + a * y
    r_ref[3:4, :] = b * xy + a * z
    r_ref[4:5, :] = 1.0 - b * (xx + zz)
    r_ref[5:6, :] = b * yz - a * x
    r_ref[6:7, :] = b * xz - a * y
    r_ref[7:8, :] = b * yz + a * x
    r_ref[8:9, :] = 1.0 - b * (xx + yy)

    # (4) pushed log-density (principal branch).
    # (v - loc)/scale == eps exactly, so no divide/reciprocal is needed.
    lp_rows = -0.5 * (eps * eps) - log_scale - 0.5 * _LOG_2PI   # (3, T)
    base_lp = lp_rows[0:1, :] + lp_rows[1:2, :] + lp_rows[2:3, :]
    # |det J_exp(v)| = 2*(1 - cos t)/t^2 == 2*b (Taylor branch included).
    lp_ref[...] = base_lp - jnp.log(2.0 * b)


def pushed_gaussian_forward(loc, pre_scale, eps, *, tile=2048):
    """Fused sample / exp-map / log-prob kernel.

    Args:
      loc:       (3,)   algebra-space mean parameter
      pre_scale: (3,)   pre-softplus scale parameter
      eps:       (N, 3) standard-normal noise
      tile:      lane-tile size (multiple of 128)
    Returns:
      v (N, 3) algebra samples, R (N, 9) rotation matrices, lp (N, 1) log-probs.
    """
    n = eps.shape[0]

    # Wrapper-side layout plumbing: batch on lanes, components on sublanes.
    loc_c = loc.reshape(3, 1).astype(jnp.float32)
    pre_c = pre_scale.reshape(3, 1).astype(jnp.float32)
    eps_t = jnp.transpose(eps.astype(jnp.float32))          # (3, N)

    n_pad128 = max(128, ((n + 127) // 128) * 128)
    t = min(tile, n_pad128)
    n_pad = ((n_pad128 + t - 1) // t) * t
    if n_pad != n:
        eps_t = jnp.pad(eps_t, ((0, 0), (0, n_pad - n)))
    grid = (n_pad // t,)

    out_shape = (
        jax.ShapeDtypeStruct((3, n_pad), jnp.float32),
        jax.ShapeDtypeStruct((9, n_pad), jnp.float32),
        jax.ShapeDtypeStruct((1, n_pad), jnp.float32),
    )

    v_t, r_t, lp_t = pl.pallas_call(
        _pushed_gaussian_kernel,
        out_shape=out_shape,
        grid=grid,
        in_specs=[
            pl.BlockSpec((3, 1), lambda i: (0, 0)),   # loc (replicated)
            pl.BlockSpec((3, 1), lambda i: (0, 0)),   # pre_scale (replicated)
            pl.BlockSpec((3, t), lambda i: (0, i)),   # eps tile
        ],
        out_specs=(
            pl.BlockSpec((3, t), lambda i: (0, i)),
            pl.BlockSpec((9, t), lambda i: (0, i)),
            pl.BlockSpec((1, t), lambda i: (0, i)),
        ),
        compiler_params=pltpu.CompilerParams(
            dimension_semantics=("parallel",)),
    )(loc_c, pre_c, eps_t)

    # Back to row-major (N, ...) layouts expected by callers.
    v = jnp.transpose(v_t[:, :n])
    r = jnp.transpose(r_t[:, :n])
    lp = jnp.transpose(lp_t[:, :n])
    return v, r, lp


def _reference(loc, pre_scale, eps):
    """Pure-JAX reference (principal branch) for validation."""
    scale = jax.nn.softplus(pre_scale)
    v = loc + scale * eps                                    # (N, 3)
    theta = jnp.linalg.norm(v, axis=-1, keepdims=True)       # (N, 1)
    small = theta < 1e-3
    safe_t = jnp.where(small, 1.0, theta)
    sin_h = jnp.sin(0.5 * safe_t)
    a = jnp.where(small, 1.0 - theta * theta / 6.0,
                  jnp.sin(safe_t) / safe_t)
    b = jnp.where(small, 0.5 - theta * theta / 24.0,
                  2.0 * sin_h * sin_h / (safe_t * safe_t))
    zeros = jnp.zeros_like(v[:, 0])
    K = jnp.stack([
        jnp.stack([zeros, -v[:, 2], v[:, 1]], -1),
        jnp.stack([v[:, 2], zeros, -v[:, 0]], -1),
        jnp.stack([-v[:, 1], v[:, 0], zeros], -1)], -2)
    eye = jnp.eye(3)[None]
    R = eye + a[..., None] * K + b[..., None] * jnp.einsum('nij,njk->nik', K, K)
    base_lp = jnp.sum(-0.5 * ((v - loc) / scale) ** 2 - jnp.log(scale)
                      - 0.5 * jnp.log(2.0 * jnp.pi), axis=-1, keepdims=True)
    lp = base_lp - jnp.log(2.0 * b)
    return v, R.reshape(-1, 9), lp


if __name__ == "__main__":
    key = jax.random.PRNGKey(0)
    k_loc, k_pre, k_eps = jax.random.split(key, 3)

    # Parameters as in the module __init__ (shape (3,)), deterministic init.
    loc = jnp.zeros((3,), jnp.float32) + 0.1 * jax.random.normal(k_loc, (3,))
    pre_scale = jnp.ones((3,), jnp.float32) + 0.1 * jax.random.normal(k_pre, (3,))

    n_samples = 8
    eps = jax.random.normal(k_eps, (n_samples, 3), jnp.float32)

    v, R, lp = pushed_gaussian_forward(loc, pre_scale, eps)
    jax.block_until_ready((v, R, lp))

    v_ref, R_ref, lp_ref = _reference(loc, pre_scale, eps)
    assert jnp.allclose(v, v_ref, atol=1e-5), "algebra samples mismatch"
    assert jnp.allclose(R, R_ref, atol=1e-4), "rotation matrices mismatch"
    assert jnp.allclose(lp, lp_ref, atol=1e-4), "log-prob mismatch"

    # Sanity: pushed samples are valid rotations (R R^T = I).
    Rm = R.reshape(n_samples, 3, 3)
    rrt = jnp.einsum('nij,nkj->nik', Rm, Rm)
    assert jnp.allclose(rrt, jnp.eye(3)[None], atol=1e-4), "not orthonormal"

    print("KERNEL_OK")
</pallas_src>

<mosaic_0001>
module attributes {stable_mosaic.version = 11 : i64} {
  func.func @_pushed_gaussian_kernel(%arg0: i32, %arg1: memref<3x1xf32, #tpu.memory_space<vmem>>, %arg2: memref<3x1xf32, #tpu.memory_space<vmem>>, %arg3: memref<3x128xf32, #tpu.memory_space<vmem>>, %arg4: memref<3x128xf32, #tpu.memory_space<vmem>>, %arg5: memref<9x128xf32, #tpu.memory_space<vmem>>, %arg6: memref<1x128xf32, #tpu.memory_space<vmem>>) attributes {dimension_semantics = [#tpu.dimension_semantics<parallel>], iteration_bounds = array<i64: 1>, scalar_prefetch = 0 : i64, scratch_operands = 0 : i64, tpu.core_type = #tpu.core_type<tc>, window_params = [{pipeline_mode = #tpu.pipeline_mode<synchronous>, transform_indices = @transform_0, window_bounds = array<i64: 3, 1>}, {pipeline_mode = #tpu.pipeline_mode<synchronous>, transform_indices = @transform_1, window_bounds = array<i64: 3, 1>}, {transform_indices = @transform_2, window_bounds = array<i64: 3, 128>}, {transform_indices = @transform_3, window_bounds = array<i64: 3, 128>}, {transform_indices = @transform_4, window_bounds = array<i64: 9, 128>}, {transform_indices = @transform_5, window_bounds = array<i64: 1, 128>}]} {
    %c0 = arith.constant 0 : index
    %c0_0 = arith.constant 0 : index
    %0 = vector.load %arg1[%c0, %c0_0] : memref<3x1xf32, #tpu.memory_space<vmem>>, vector<3x1xf32>
    %c0_1 = arith.constant 0 : index
    %c0_2 = arith.constant 0 : index
    %1 = vector.load %arg2[%c0_1, %c0_2] : memref<3x1xf32, #tpu.memory_space<vmem>>, vector<3x1xf32>
    %c0_3 = arith.constant 0 : index
    %c0_4 = arith.constant 0 : index
    %2 = vector.load %arg3[%c0_3, %c0_4] : memref<3x128xf32, #tpu.memory_space<vmem>>, vector<3x128xf32>
    %cst = arith.constant 0.000000e+00 : f32
    %3 = vector.broadcast %cst : f32 to vector<3x1xf32>
    %4 = arith.maximumf %1, %3 : vector<3x1xf32>
    %5 = vector.broadcast %cst : f32 to vector<3x1xf32>
    %6 = arith.subf %1, %5 : vector<3x1xf32>
    %7 = arith.cmpf one, %6, %6 : vector<3x1xf32>
    %8 = vector.broadcast %cst : f32 to vector<3x1xf32>
    %9 = arith.addf %1, %8 : vector<3x1xf32>
    %10 = math.absf %6 : vector<3x1xf32>
    %cst_5 = arith.constant 0.000000e+00 : f32
    %11 = vector.broadcast %cst_5 : f32 to vector<3x1xf32>
    %12 = arith.subf %11, %10 : vector<3x1xf32>
    %13 = math.exp %12 : vector<3x1xf32>
    %14 = math.log1p %13 : vector<3x1xf32>
    %15 = arith.addf %4, %14 : vector<3x1xf32>
    %16 = arith.select %7, %9, %15 : vector<3x1xi1>, vector<3x1xf32>
    %17 = math.log %16 : vector<3x1xf32>
    %18 = vector.broadcast %16 : vector<3x1xf32> to vector<3x128xf32>
    %19 = arith.mulf %18, %2 : vector<3x128xf32>
    %20 = vector.broadcast %0 : vector<3x1xf32> to vector<3x128xf32>
    %21 = arith.addf %20, %19 : vector<3x128xf32>
    %c0_6 = arith.constant 0 : index
    %c0_7 = arith.constant 0 : index
    %22 = vector.load %arg4[%c0_6, %c0_7] : memref<3x128xf32, #tpu.memory_space<vmem>>, vector<3x128xf32>
    tpu.vector_store %arg4[%c0_6, %c0_7], %21 {strides = array<i32>} : memref<3x128xf32, #tpu.memory_space<vmem>>, vector<3x128xf32>,
    %23 = vector.extract_strided_slice %21 {offsets = [0, 0], sizes = [1, 128], strides = [1, 1]} : vector<3x128xf32> to vector<1x128xf32>
    %24 = vector.extract_strided_slice %21 {offsets = [1, 0], sizes = [1, 128], strides = [1, 1]} : vector<3x128xf32> to vector<1x128xf32>
    %25 = vector.extract_strided_slice %21 {offsets = [2, 0], sizes = [1, 128], strides = [1, 1]} : vector<3x128xf32> to vector<1x128xf32>
    %26 = arith.mulf %23, %23 : vector<1x128xf32>
    %27 = arith.mulf %24, %24 : vector<1x128xf32>
    %28 = arith.mulf %25, %25 : vector<1x128xf32>
    %29 = arith.mulf %23, %24 : vector<1x128xf32>
    %30 = arith.mulf %23, %25 : vector<1x128xf32>
    %31 = arith.mulf %24, %25 : vector<1x128xf32>
    %32 = arith.addf %26, %27 : vector<1x128xf32>
    %33 = arith.addf %32, %28 : vector<1x128xf32>
    %34 = math.sqrt %33 : vector<1x128xf32>
    %cst_8 = arith.constant 1.000000e-03 : f32
    %35 = vector.broadcast %cst_8 : f32 to vector<1x128xf32>
    %36 = arith.cmpf olt, %34, %35 : vector<1x128xf32>
    %cst_9 = arith.constant 1.000000e+00 : f32
    %37 = vector.broadcast %cst_9 : f32 to vector<1x128xf32>
    %38 = arith.select %36, %37, %34 : vector<1x128xi1>, vector<1x128xf32>
    %cst_10 = arith.constant 1.000000e+00 : f32
    %39 = vector.broadcast %cst_10 : f32 to vector<1x128xf32>
    %40 = arith.select %36, %39, %33 : vector<1x128xi1>, vector<1x128xf32>
    %41 = math.sin %38 : vector<1x128xf32>
    %cst_11 = arith.constant 5.000000e-01 : f32
    %42 = vector.broadcast %cst_11 : f32 to vector<1x128xf32>
    %43 = arith.mulf %42, %38 : vector<1x128xf32>
    %44 = math.sin %43 : vector<1x128xf32>
    %cst_12 = arith.constant 0.166666672 : f32
    %45 = vector.broadcast %cst_12 : f32 to vector<1x128xf32>
    %46 = arith.mulf %33, %45 : vector<1x128xf32>
    %cst_13 = arith.constant 1.000000e+00 : f32
    %47 = vector.broadcast %cst_13 : f32 to vector<1x128xf32>
    %48 = arith.subf %47, %46 : vector<1x128xf32>
    %49 = arith.divf %41, %38 : vector<1x128xf32>
    %50 = arith.select %36, %48, %49 : vector<1x128xi1>, vector<1x128xf32>
    %cst_14 = arith.constant 0.0416666679 : f32
    %51 = vector.broadcast %cst_14 : f32 to vector<1x128xf32>
    %52 = arith.mulf %33, %51 : vector<1x128xf32>
    %cst_15 = arith.constant 5.000000e-01 : f32
    %53 = vector.broadcast %cst_15 : f32 to vector<1x128xf32>
    %54 = arith.subf %53, %52 : vector<1x128xf32>
    %cst_16 = arith.constant 2.000000e+00 : f32
    %55 = vector.broadcast %cst_16 : f32 to vector<1x128xf32>
    %56 = arith.mulf %55, %44 : vector<1x128xf32>
    %57 = arith.mulf %56, %44 : vector<1x128xf32>
    %58 = arith.divf %57, %40 : vector<1x128xf32>
    %59 = arith.select %36, %54, %58 : vector<1x128xi1>, vector<1x128xf32>
    %60 = arith.addf %27, %28 : vector<1x128xf32>
    %61 = arith.mulf %59, %60 : vector<1x128xf32>
    %cst_17 = arith.constant 1.000000e+00 : f32
    %62 = vector.broadcast %cst_17 : f32 to vector<1x128xf32>
    %63 = arith.subf %62, %61 : vector<1x128xf32>
    %c0_18 = arith.constant 0 : index
    %c0_19 = arith.constant 0 : index
    %64 = vector.load %arg5[%c0_18, %c0_19] : memref<9x128xf32, #tpu.memory_space<vmem>>, vector<1x128xf32>
    tpu.vector_store %arg5[%c0_18, %c0_19], %63 {strides = array<i32>} : memref<9x128xf32, #tpu.memory_space<vmem>>, vector<1x128xf32>,
    %65 = arith.mulf %59, %29 : vector<1x128xf32>
    %66 = arith.mulf %50, %25 : vector<1x128xf32>
    %67 = arith.subf %65, %66 : vector<1x128xf32>
    %c1 = arith.constant 1 : index
    %c0_20 = arith.constant 0 : index
    %68 = vector.load %arg5[%c1, %c0_20] : memref<9x128xf32, #tpu.memory_space<vmem>>, vector<1x128xf32>
    tpu.vector_store %arg5[%c1, %c0_20], %67 {strides = array<i32>} : memref<9x128xf32, #tpu.memory_space<vmem>>, vector<1x128xf32>,
    %69 = arith.mulf %59, %30 : vector<1x128xf32>
    %70 = arith.mulf %50, %24 : vector<1x128xf32>
    %71 = arith.addf %69, %70 : vector<1x128xf32>
    %c2 = arith.constant 2 : index
    %c0_21 = arith.constant 0 : index
    %72 = vector.load %arg5[%c2, %c0_21] : memref<9x128xf32, #tpu.memory_space<vmem>>, vector<1x128xf32>
    tpu.vector_store %arg5[%c2, %c0_21], %71 {strides = array<i32>} : memref<9x128xf32, #tpu.memory_space<vmem>>, vector<1x128xf32>,
    %73 = arith.mulf %59, %29 : vector<1x128xf32>
    %74 = arith.mulf %50, %25 : vector<1x128xf32>
    %75 = arith.addf %73, %74 : vector<1x128xf32>
    %c3 = arith.constant 3 : index
    %c0_22 = arith.constant 0 : index
    %76 = vector.load %arg5[%c3, %c0_22] : memref<9x128xf32, #tpu.memory_space<vmem>>, vector<1x128xf32>
    tpu.vector_store %arg5[%c3, %c0_22], %75 {strides = array<i32>} : memref<9x128xf32, #tpu.memory_space<vmem>>, vector<1x128xf32>,
    %77 = arith.addf %26, %28 : vector<1x128xf32>
    %78 = arith.mulf %59, %77 : vector<1x128xf32>
    %cst_23 = arith.constant 1.000000e+00 : f32
    %79 = vector.broadcast %cst_23 : f32 to vector<1x128xf32>
    %80 = arith.subf %79, %78 : vector<1x128xf32>
    %c4 = arith.constant 4 : index
    %c0_24 = arith.constant 0 : index
    %81 = vector.load %arg5[%c4, %c0_24] : memref<9x128xf32, #tpu.memory_space<vmem>>, vector<1x128xf32>
    tpu.vector_store %arg5[%c4, %c0_24], %80 {strides = array<i32>} : memref<9x128xf32, #tpu.memory_space<vmem>>, vector<1x128xf32>,
    %82 = arith.mulf %59, %31 : vector<1x128xf32>
    %83 = arith.mulf %50, %23 : vector<1x128xf32>
    %84 = arith.subf %82, %83 : vector<1x128xf32>
    %c5 = arith.constant 5 : index
    %c0_25 = arith.constant 0 : index
    %85 = vector.load %arg5[%c5, %c0_25] : memref<9x128xf32, #tpu.memory_space<vmem>>, vector<1x128xf32>
    tpu.vector_store %arg5[%c5, %c0_25], %84 {strides = array<i32>} : memref<9x128xf32, #tpu.memory_space<vmem>>, vector<1x128xf32>,
    %86 = arith.mulf %59, %30 : vector<1x128xf32>
    %87 = arith.mulf %50, %24 : vector<1x128xf32>
    %88 = arith.subf %86, %87 : vector<1x128xf32>
    %c6 = arith.constant 6 : index
    %c0_26 = arith.constant 0 : index
    %89 = vector.load %arg5[%c6, %c0_26] : memref<9x128xf32, #tpu.memory_space<vmem>>, vector<1x128xf32>
    tpu.vector_store %arg5[%c6, %c0_26], %88 {strides = array<i32>} : memref<9x128xf32, #tpu.memory_space<vmem>>, vector<1x128xf32>,
    %90 = arith.mulf %59, %31 : vector<1x128xf32>
    %91 = arith.mulf %50, %23 : vector<1x128xf32>
    %92 = arith.addf %90, %91 : vector<1x128xf32>
    %c7 = arith.constant 7 : index
    %c0_27 = arith.constant 0 : index
    %93 = vector.load %arg5[%c7, %c0_27] : memref<9x128xf32, #tpu.memory_space<vmem>>, vector<1x128xf32>
    tpu.vector_store %arg5[%c7, %c0_27], %92 {strides = array<i32>} : memref<9x128xf32, #tpu.memory_space<vmem>>, vector<1x128xf32>,
    %94 = arith.addf %26, %27 : vector<1x128xf32>
    %95 = arith.mulf %59, %94 : vector<1x128xf32>
    %cst_28 = arith.constant 1.000000e+00 : f32
    %96 = vector.broadcast %cst_28 : f32 to vector<1x128xf32>
    %97 = arith.subf %96, %95 : vector<1x128xf32>
    %c8 = arith.constant 8 : index
    %c0_29 = arith.constant 0 : index
    %98 = vector.load %arg5[%c8, %c0_29] : memref<9x128xf32, #tpu.memory_space<vmem>>, vector<1x128xf32>
    tpu.vector_store %arg5[%c8, %c0_29], %97 {strides = array<i32>} : memref<9x128xf32, #tpu.memory_space<vmem>>, vector<1x128xf32>,
    %99 = arith.mulf %2, %2 : vector<3x128xf32>
    %cst_30 = arith.constant -5.000000e-01 : f32
    %100 = vector.broadcast %cst_30 : f32 to vector<3x128xf32>
    %101 = arith.mulf %100, %99 : vector<3x128xf32>
    %102 = vector.broadcast %17 : vector<3x1xf32> to vector<3x128xf32>
    %103 = arith.subf %101, %102 : vector<3x128xf32>
    %cst_31 = arith.constant 0.918938517 : f32
    %104 = vector.broadcast %cst_31 : f32 to vector<3x128xf32>
    %105 = arith.subf %103, %104 : vector<3x128xf32>
    %106 = vector.extract_strided_slice %105 {offsets = [0, 0], sizes = [1, 128], strides = [1, 1]} : vector<3x128xf32> to vector<1x128xf32>
    %107 = vector.extract_strided_slice %105 {offsets = [1, 0], sizes = [1, 128], strides = [1, 1]} : vector<3x128xf32> to vector<1x128xf32>
    %108 = arith.addf %106, %107 : vector<1x128xf32>
    %109 = vector.extract_strided_slice %105 {offsets = [2, 0], sizes = [1, 128], strides = [1, 1]} : vector<3x128xf32> to vector<1x128xf32>
    %110 = arith.addf %108, %109 : vector<1x128xf32>
    %cst_32 = arith.constant 2.000000e+00 : f32
    %111 = vector.broadcast %cst_32 : f32 to vector<1x128xf32>
    %112 = arith.mulf %111, %59 : vector<1x128xf32>
    %113 = math.log %112 : vector<1x128xf32>
    %114 = arith.subf %110, %113 : vector<1x128xf32>
    %c0_33 = arith.constant 0 : index
    %c0_34 = arith.constant 0 : index
    %115 = vector.load %arg6[%c0_33, %c0_34] : memref<1x128xf32, #tpu.memory_space<vmem>>, vector<1x128xf32>
    tpu.vector_store %arg6[%c0_33, %c0_34], %114 {strides = array<i32>} : memref<1x128xf32, #tpu.memory_space<vmem>>, vector<1x128xf32>,
    return
  }
  func.func @transform_0(%arg0: i32) -> (i32, i32) {
    %c0_i32 = arith.constant 0 : i32
    %c0_i32_0 = arith.constant 0 : i32
    %c0_i32_1 = arith.constant 0 : i32
    return %c0_i32, %c0_i32_0 : i32, i32
  }
  func.func @transform_1(%arg0: i32) -> (i32, i32) {
    %c0_i32 = arith.constant 0 : i32
    %c0_i32_0 = arith.constant 0 : i32
    %c0_i32_1 = arith.constant 0 : i32
    return %c0_i32, %c0_i32_0 : i32, i32
  }
  func.func @transform_2(%arg0: i32) -> (i32, i32) {
    %c0_i32 = arith.constant 0 : i32
    %c0_i32_0 = arith.constant 0 : i32
    return %c0_i32, %arg0 : i32, i32
  }
  func.func @transform_3(%arg0: i32) -> (i32, i32) {
    %c0_i32 = arith.constant 0 : i32
    %c0_i32_0 = arith.constant 0 : i32
    return %c0_i32, %arg0 : i32, i32
  }
  func.func @transform_4(%arg0: i32) -> (i32, i32) {
    %c0_i32 = arith.constant 0 : i32
    %c0_i32_0 = arith.constant 0 : i32
    return %c0_i32, %arg0 : i32, i32
  }
  func.func @transform_5(%arg0: i32) -> (i32, i32) {
    %c0_i32 = arith.constant 0 : i32
    %c0_i32_0 = arith.constant 0 : i32
    return %c0_i32, %arg0 : i32, i32
  }
}

</mosaic_0001>

<bundles_post_ra>
// kernel: tpu_custom_call.1
= control target key start
LH: loop header
LB: loop body
LE: loop exit
PB: predicated region body
PF: predicated region fallthrough
CT: control target
= control target key end

     0   :  { %11 = vsyncpa [#allocation3], 0  ;;  %v522_v1 = vmov 0   ;;  %s726_s0 = inlined_call_operand.vmem [shape: f32[3,1], index: 0, kind: input, shape index: {}]   ;;  %s727_s1 = inlined_call_operand.vmem [shape: f32[3,1], index: 1, kind: input, shape index: {}]   ;;  %s728_s2 = inlined_call_operand.vmem [shape: f32[3,128], index: 2, kind: input, shape index: {}]   ;;  %s729_s3 = inlined_call_operand.hbm [shape: f32[3,128], index: 3, kind: output, shape index: {0}]   ;;  %s730_s4 = inlined_call_operand.hbm [shape: f32[9,128], index: 4, kind: output, shape index: {1}]   ;;  %s731_s5 = inlined_call_operand.hbm [shape: f32[1,128], index: 5, kind: output, shape index: {2}]  }
   0x1   :  { %v20_v0 = vld [vmem:[%s727_s1] sm:$0x7]  ;;  %428 = vset.pattern.permute.xlu0 %v522_v1  ;;  %429 = vset.pattern.permute.xlu1 %v522_v1 }
   0x2   :  { %v25_v2 = vand.u32 2147483647, %v20_v0 }
   0x3   :  { %12 = vsyncpa [#allocation5], 0  ;;  %v22_v12 = vmax.f32 %v20_v0, 0.0  ;;  %vm23_vm1 = vcmp.ne.f32.partialorder %v20_v0, %v20_v0  ;;  %v19_v17 = vld [vmem:[%s726_s0] sm:$0x7]  ;;  %s523_s0 = smov [#allocation2]  }
   0x4   :  { %v26_v3 = vsub.f32 0.0, %v25_v2  ;;  %v573_v20 = vld [vmem:[%s728_s2] sm:$0x7]  ;;  %s362_s2 = sshll.u32 %s523_s0, 4  ;;  %s363_s2 = int_to_ptr.vmem [resolvable:$true] %s362_s2 }
   0x5   :  { %s452_s23 = scalar_lea.vmem %s363_s2, 64  ;;  %p457_p1 = scmp.lt.s32.totalorder %s363_s2, %s363_s2 }
   0x6   :  { %v27_v4 = vmul.f32 1.442695, %v26_v3  ;;  %p453_p0 = scmp.ne.s32.totalorder %s363_s2, %s452_s23  ;;  %p458_p2 = scmp.lt.s32.totalorder %s452_s23, %s452_s23 }
   0x8   :  { %430 = vpow2.f32 %v27_v4  ;;  %p459_p3 = por %p458_p2, %p457_p1 }
   0xa   :  { %p460_p4 = pnand %p459_p3, %p453_p0 }
  0x12   :  { %v431_v5 = vpop.eup %430 }
  0x13   :  { %v29_v6 = vadd.f32 1.0, %v431_v5  ;;  %v32_v7 = vmul.f32 -0.5, %v431_v5  ;;  %v35_v9 = vand.u32 2147483647, %v431_v5 }
  0x15   :  { %432 = vlog2.f32 %v29_v6  ;;  %v33_v8 = vadd.f32 1.0, %v32_v7  ;;  %vm36_vm0 = vcmp.lt.f32.partialorder %v35_v9, 0.0004427343 }
  0x17   :  { %v34_v10 = vmul.f32 %v431_v5, %v33_v8 }
  0x1f   :  { %v433_v11 = vpop.eup %432 }
  0x20   :  { %v31_v13 = vmul.f32 0.6931472, %v433_v11 }
  0x22   :  { %v37_v14 = vsel %vm36_vm0, %v34_v10, %v31_v13 }
  0x23   :  { %v38_v15 = vadd.f32 %v37_v14, %v22_v12 }
  0x25   :  { %v39_v16 = vsel %vm23_vm1, %v20_v0, %v38_v15 }
  0x26   :  { %44 = vperm.xlu0 %428, %v39_v16   ;;  %434 = vlog2.f32 %v39_v16 }
  0x2a   :  { %50 = vperm.xlu0 %428, %v19_v17  }
  0x30   :  { %v435_v18 = vpop.eup %434 }
  0x31   :  { %v41_v19 = vmul.f32 0.6931472, %v435_v18 }
  0x33   :  { %339 = vperm.xlu1 %429, %v41_v19  }
  0xa5   :  { %v45_v21 = vpop.permute.xlu0 %44 }
  0xa6   :  { %v47_v22 = vmul.f32 %v45_v21, %v573_v20 }
  0xa9   :  { %v51_v23 = vpop.permute.xlu0 %50 }
  0xaa   :  { %v576_v24 = vadd.f32 %v51_v23, %v47_v22 }
  0xac   :  { %v55_v25 = vmul.f32 %v576_v24, %v576_v24  ;;  %54 = vst [vmem:[#allocation2] sm:$0x7] %v576_v24 }
  0xae   :  { %v64_v26 = vrot.slane %v55_v25, 1  ;;  %v67_v27 = vrot.slane %v55_v25, 2 }
  0xb0   :  { %v581_v28 = vadd.f32 %v64_v26, %v55_v25  ;;  %v583_v29 = vadd.f32 %v67_v27, %v55_v25 }
  0xb2   :  { %v586_v30 = vadd.f32 %v67_v27, %v581_v28 }
  0xb4   :  { %436 = vrsqrt.f32 %v586_v30 }
  0xb5   :  { %463 = shalt.err (!%p460_p4)
}
  0xb6   :  { %s464_s26 = scalar_lea.hbm %s729_s3, 64 }
  0xb7   :  { %p465_p5 = scmp.ne.s32.totalorder %s729_s3, %s464_s26  ;;  %p468_p6 = scmp.lt.u32.totalorder %s464_s26, %s729_s3 }
  0xb9   :  { %p470_p7 = pnand %p468_p6, %p465_p5 }
  0xbb   :  { %473 = shalt.err (!%p470_p7)
}
  0xbc   :  { %365 = dma.vmem_to_hbm [thread:$0]  %s363_s2, 64, %s729_s3, [#allocation3]   ;;  %vm72_vm2 = vcmp.eq.f32.partialorder %v586_v30, inf  ;;  %v75_v33 = vand.u32 2147483648, %v586_v30  ;;  %vm74_vm3 = vcmp.eq.f32.partialorder %v586_v30, 0.0 }
  0xbd   :  { %v524_v56 = vmov 683565275   ;;  %v525_v59 = vmov 2475754826   ;;  %v526_v61 = vmov 2131351028  }
  0xbe   :  { %v437_v31 = vpop.eup %436  ;;  %v527_v63 = vmov 2102212464   ;;  %v528_v1 = vmov 920167782   ;;  %v529_v8 = vmov 1326507024  }
  0xbf   :  { %v71_v32 = vmul.f32 %v437_v31, %v586_v30  ;;  %s530_s3 = smov [#allocation4]  }
  0xc0   :  { %s371_s8 = sshll.u32 %s530_s3, 4  ;;  %s372_s8 = int_to_ptr.vmem [resolvable:$true] %s371_s8 }
  0xc1   :  { %v73_v34 = vsel %vm72_vm2, %v586_v30, %v71_v32  ;;  %s474_s9 = scalar_lea.vmem %s372_s8, 256  ;;  %p479_p9 = scmp.lt.s32.totalorder %s372_s8, %s372_s8 }
  0xc2   :  { %v606_v35 = vsel %vm74_vm3, %v75_v33, %v73_v34  ;;  %p475_p8 = scmp.ne.s32.totalorder %s372_s8, %s474_s9  ;;  %p480_p10 = scmp.lt.s32.totalorder %s474_s9, %s474_s9 }
  0xc3   :  { %vm77_vm4 = vcmp.lt.f32.partialorder %v606_v35, 0.001 }
  0xc4   :  { %v612_v36 = vsel %vm77_vm4, 1.0, %v606_v35  ;;  %p481_p11 = por %p480_p10, %p479_p9 }
  0xc5   :  { %v80_v37 = vand.u32 2147483647, %v612_v36  ;;  %v83_v38 = vand.u32 2139095040, %v612_v36  ;;  %v617_v39 = vmul.f32 0.5, %v612_v36  ;;  %vm82_vm3 = vcmp.lt.s32.totalorder %v612_v36, 0 }
  0xc6   :  { %p482_p12 = pnand %p481_p11, %p475_p8 }
  0xc7   :  { %v84_v40 = vshrl.u32 %v83_v38, 23  ;;  %v87_v41 = vand.u32 8388607, %v80_v37  ;;  %v188_v42 = vand.u32 2139095040, %v617_v39  ;;  %v185_v44 = vand.u32 2147483647, %v617_v39 }
  0xc9   :  { %v399_v43 = vadd.s32 4294967169, %v84_v40  ;;  %v189_v45 = vshrl.u32 %v188_v42, 23  ;;  %v88_v47 = vor.u32 8388608, %v87_v41  ;;  %v192_v49 = vand.u32 8388607, %v185_v44 }
  0xcb   :  { %v90_v46 = vadd.s32 1, %v399_v43  ;;  %v403_v48 = vadd.s32 4294967169, %v189_v45  ;;  %v625_v54 = vshll.u32 %v88_v47, 8  ;;  %v193_v58 = vor.u32 8388608, %v192_v49 }
  0xcd   :  { %vm91_vm5 = vcmp.gt.s32.totalorder %v90_v46, 0  ;;  %v195_v51 = vadd.s32 1, %v403_v48  ;;  %v233_v32 = vshll.u32 %v193_v58, 8 }
  0xce   :  { %v92_v50 = vsel %vm91_vm5, %v90_v46, 0  ;;  %vm81_vm5 = vcmp.le.f32.partialorder %v80_v37, 0.7853982 }
  0xcf   :  { %v93_v52 = vshrl.u32 %v92_v50, 5  ;;  %v94_v53 = vand.u32 31, %v92_v50  ;;  %vm196_vm6 = vcmp.gt.s32.totalorder %v195_v51, 0 }
  0xd0   :  { %v197_v13 = vsel %vm196_vm6, %v195_v51, 0  ;;  %vm187_vm6 = vcmp.lt.s32.totalorder %v617_v39, 0 }
  0xd1   :  { %v95_v55 = vsub.s32 32, %v94_v53  ;;  %v97_v57 = vshll.u32 %v524_v56, %v94_v53  ;;  %v100_v60 = vshll.u32 %v525_v59, %v94_v53  ;;  %v103_v62 = vshll.u32 %v526_v61, %v94_v53 }
  0xd2   :  { %v106_v0 = vshll.u32 %v527_v63, %v94_v53  ;;  %v109_v2 = vshll.u32 %v528_v1, %v94_v53  ;;  %vm112_vm7 = vcmp.lt.s32.totalorder %v93_v52, 1  ;;  %vm114_vm8 = vcmp.lt.s32.totalorder %v93_v52, 3 }
  0xd3   :  { %v98_v3 = vshrl.u32 %v525_v59, %v95_v55  ;;  %v101_v4 = vshrl.u32 %v526_v61, %v95_v55  ;;  %v104_v5 = vshrl.u32 %v527_v63, %v95_v55  ;;  %v96_v6 = vshrl.u32 %v524_v56, %v95_v55 }
  0xd4   :  { %v107_v7 = vshrl.u32 %v528_v1, %v95_v55  ;;  %v110_v9 = vshrl.u32 %v529_v8, %v95_v55  ;;  %vm115_vm9 = vcmp.lt.s32.totalorder %v93_v52, 4  ;;  %v199_v16 = vand.u32 31, %v197_v13 }
  0xd5   :  { %v99_v10 = vor.u32 %v98_v3, %v97_v57  ;;  %v102_v11 = vor.u32 %v101_v4, %v100_v60  ;;  %v105_v12 = vor.u32 %v104_v5, %v103_v62  ;;  %vm113_vm10 = vcmp.lt.s32.totalorder %v93_v52, 2 }
  0xd6   :  { %v108_v14 = vor.u32 %v107_v7, %v106_v0  ;;  %v111_v15 = vor.u32 %v110_v9, %v109_v2  ;;  %v200_v26 = vsub.s32 32, %v199_v16  ;;  %v198_v40 = vshrl.u32 %v197_v13, 5 }
  0xd7   :  { %v116_v17 = vsel %vm112_vm7, %v96_v6, %v99_v10  ;;  %v117_v18 = vsel %vm115_vm9, %v105_v12, 2102212464  ;;  %v120_v19 = vsel %vm112_vm7, %v99_v10, %v102_v11  ;;  %v124_v21 = vsel %vm112_vm7, %v102_v11, %v105_v12 }
  0xd8   :  { %v118_v22 = vsel %vm114_vm8, %v102_v11, %v117_v18  ;;  %v121_v23 = vsel %vm115_vm9, %v108_v14, 920167782  ;;  %v125_v25 = vsel %vm115_vm9, %v111_v15, 1326507024  ;;  %v202_v46 = vshll.u32 %v524_v56, %v199_v16 }
  0xd9   :  { %v122_v27 = vsel %vm114_vm8, %v105_v12, %v121_v23  ;;  %v126_v31 = vsel %vm114_vm8, %v108_v14, %v125_v25  ;;  %v119_v33 = vsel %vm113_vm10, %v116_v17, %v118_v22  ;;  %v203_v47 = vshrl.u32 %v525_v59, %v200_v26 }
  0xda   :  { %v123_v34 = vsel %vm113_vm10, %v120_v19, %v122_v27  ;;  %v127_v38 = vsel %vm113_vm10, %v124_v21, %v126_v31  ;;  %v205_v48 = vshll.u32 %v525_v59, %v199_v16  ;;  %v206_v49 = vshrl.u32 %v526_v61, %v200_v26 }
  0xdb   :  { %v637_v41 = vmul.u32.u64.low %v625_v54, %v127_v38  ;;  %v638_v42 = vmul.u32.u64.high %v625_v54, %v127_v38, %v637_v41  ;;  %v641_v43 = vmul.u32.u64.low %v625_v54, %v123_v34  ;;  %v642_v45 = vmul.u32.u64.high %v625_v54, %v123_v34, %v641_v43 }
  0xdc   :  { %v208_v50 = vshll.u32 %v526_v61, %v199_v16  ;;  %v209_v51 = vshrl.u32 %v527_v63, %v200_v26  ;;  %v211_v52 = vshll.u32 %v527_v63, %v199_v16  ;;  %v212_v53 = vshrl.u32 %v528_v1, %v200_v26 }
  0xdd   :  { %v204_v55 = vor.u32 %v203_v47, %v202_v46  ;;  %v207_v57 = vor.u32 %v206_v49, %v205_v48  ;;  %v214_v58 = vshll.u32 %v528_v1, %v199_v16  ;;  %v215_v60 = vshrl.u32 %v529_v8, %v200_v26 }
  0xde   :  { %v135_v62 = vmul.u32 %v625_v54, %v119_v33  ;;  %vm137_vm11 = vc.u32 %v638_v42, %v641_v43  ;;  %v138_v0 = vadd.s32 1, %v642_v45  ;;  %v210_v2 = vor.u32 %v209_v51, %v208_v50 }
  0xdf   :  { %v201_v3 = vshrl.u32 %v524_v56, %v200_v26  ;;  %v213_v59 = vor.u32 %v212_v53, %v211_v52  ;;  %v216_v4 = vor.u32 %v215_v60, %v214_v58  ;;  %vm217_vm12 = vcmp.lt.s32.totalorder %v198_v40, 1 }
  0xe0   :  { %v139_v61 = vsel %vm137_vm11, %v138_v0, %v642_v45  ;;  %vm219_vm13 = vcmp.lt.s32.totalorder %v198_v40, 3  ;;  %vm220_vm14 = vcmp.lt.s32.totalorder %v198_v40, 4  ;;  %v225_v63 = vsel %vm217_vm12, %v204_v55, %v207_v57 }
  0xe1   :  { %v140_v1 = vadd.s32 %v139_v61, %v135_v62  ;;  %v222_v5 = vsel %vm220_vm14, %v210_v2, 2102212464  ;;  %v226_v6 = vsel %vm220_vm14, %v213_v59, 920167782  ;;  %v229_v54 = vsel %vm217_vm12, %v207_v57, %v210_v2 }
  0xe2   :  { %vm218_vm15 = vcmp.lt.s32.totalorder %v198_v40, 2  ;;  %v221_v7 = vsel %vm217_vm12, %v201_v3, %v204_v55  ;;  %v227_v8 = vsel %vm219_vm13, %v210_v2, %v226_v6  ;;  %v230_v9 = vsel %vm220_vm14, %v216_v4, 1326507024 }
  0xe3   :  { %v141_v10 = vadd.s32 536870912, %v140_v1  ;;  %v223_v11 = vsel %vm219_vm13, %v207_v57, %v222_v5  ;;  %v228_v12 = vsel %vm218_vm15, %v225_v63, %v227_v8  ;;  %v231_v56 = vsel %vm219_vm13, %v213_v59, %v230_v9 }
  0xe4   :  { %v232_v13 = vsel %vm218_vm15, %v229_v54, %v231_v56  ;;  %v652_v14 = vmul.u32.u64.low %v233_v32, %v228_v12  ;;  %v653_v15 = vmul.u32.u64.high %v233_v32, %v228_v12, %v652_v14  ;;  %v224_v19 = vsel %vm218_vm15, %v221_v7, %v223_v11 }
  0xe5   :  { %v142_v16 = vshrl.u32 %v141_v10, 30  ;;  %v655_v17 = vmul.u32.u64.low %v233_v32, %v232_v13  ;;  %v656_v18 = vmul.u32.u64.high %v233_v32, %v232_v13, %v655_v17  ;;  %v240_v25 = vmul.u32 %v233_v32, %v224_v19 }
  0xe6   :  { %v243_v22 = vadd.s32 1, %v653_v15  ;;  %v136_v48 = vadd.s32 %v641_v43, %v638_v42  ;;  %vm672_vm7 = vcmp.le.f32.partialorder %v185_v44, 0.7853982  ;;  %vm172_vm11 = vweird.f32 %v612_v36 }
  0xe7   :  { %v143_v21 = vshll.u32 %v142_v16, 30  ;;  %vm242_vm0 = vc.u32 %v656_v18, %v652_v14  ;;  %v166_v4 = vsub.s32 4, %v142_v16  ;;  %v241_v42 = vadd.s32 %v652_v14, %v656_v18 }
  0xe8   :  { %v244_v26 = vsel %vm242_vm0, %v243_v22, %v653_v15  ;;  %vm277_vm15 = vweird.f32 %v617_v39 }
  0xe9   :  { %v144_v23 = vsub.s32 %v140_v1, %v143_v21  ;;  %v245_v31 = vadd.s32 %v244_v26, %v240_v25  ;;  %v167_v8 = vsel %vm82_vm3, %v166_v4, %v142_v16 }
  0xea   :  { %v169_v12 = vsel %vm81_vm5, 0, %v167_v8 }
  0xeb   :  { %v146_v27 = vsub.s32 0, %v144_v23  ;;  %v246_v34 = vadd.s32 536870912, %v245_v31  ;;  %v173_v15 = vadd.s32 3, %v169_v12 }
  0xed   :  { %v400_v33 = vmin.u32 %v146_v27, %v144_v23  ;;  %v247_v40 = vshrl.u32 %v246_v34, 30  ;;  %v174_v21 = vand.u32 3, %v173_v15  ;;  %v289_v34 = vmul.f32 0.16666667, %v586_v30 }
  0xef   :  { %v148_v38 = vclz %v400_v33  ;;  %v248_v45 = vshll.u32 %v247_v40, 30  ;;  %v271_v18 = vsub.s32 4, %v247_v40  ;;  %vm179_vm8 = vcmp.eq.s32.totalorder %v174_v21, 2 }
  0xf0   :  { %vm176_vm9 = vcmp.eq.s32.totalorder %v174_v21, 0  ;;  %vm175_vm10 = vcmp.lt.s32.totalorder %v174_v21, 2 }
  0xf1   :  { %v401_v41 = vadd.s32 4294967294, %v148_v38  ;;  %v249_v47 = vsub.s32 %v245_v31, %v248_v45  ;;  %v272_v22 = vsel %vm187_vm6, %v271_v18, %v247_v40 }
  0xf2   :  { %v274_v33 = vsel %vm672_vm7, 0, %v272_v22 }
  0xf3   :  { %vm402_vm1 = vcmp.lt.s32.totalorder %v401_v41, 0  ;;  %v251_v50 = vsub.s32 0, %v249_v47 }
  0xf4   :  { %v151_v46 = vsel %vm402_vm1, 0, %v401_v41  ;;  %v278_v41 = vadd.s32 3, %v274_v33 }
  0xf5   :  { %v152_v49 = vsub.s32 32, %v151_v46  ;;  %v156_v32 = vsub.s32 4294967266, %v151_v46  ;;  %v153_v51 = vshll.u32 %v144_v23, %v151_v46  ;;  %v404_v55 = vmin.u32 %v251_v50, %v249_v47 }
  0xf7   :  { %v154_v52 = vshrl.u32 %v136_v48, %v152_v49  ;;  %v157_v53 = vadd.s32 127, %v156_v32  ;;  %v253_v60 = vclz %v404_v55  ;;  %v79_v49 = vsel %vm77_vm4, 1.0, %v586_v30 }
  0xf8   :  { %v279_v32 = vand.u32 3, %v278_v41 }
  0xf9   :  { %v155_v57 = vor.u32 %v154_v52, %v153_v51  ;;  %v158_v58 = vshll.u32 %v157_v53, 23  ;;  %v405_v0 = vadd.s32 4294967294, %v253_v60 }
  0xfa   :  { %vm284_vm12 = vcmp.eq.s32.totalorder %v279_v32, 2  ;;  %vm281_vm13 = vcmp.eq.s32.totalorder %v279_v32, 0  ;;  %vm280_vm14 = vcmp.lt.s32.totalorder %v279_v32, 2 }
  0xfb   :  { %v159_v62 = vor.u32 4788187, %v158_v58  ;;  %v162_v3 = vcvt.s32.f32 %v155_v57  ;;  %vm406_vm2 = vcmp.lt.s32.totalorder %v405_v0, 0  ;;  %v57_v58 = vrot.slane %v576_v24, 1 }
  0xfc   :  { %v256_v61 = vsel %vm406_vm2, 0, %v405_v0 }
  0xfd   :  { %v160_v2 = vand.u32 2147483647, %v159_v62  ;;  %v257_v43 = vsub.s32 32, %v256_v61  ;;  %v261_v63 = vsub.s32 4294967266, %v256_v61  ;;  %v258_v5 = vshll.u32 %v249_v47, %v256_v61 }
  0xfe   :  { %v290_v47 = vsub.f32 1.0, %v289_v34  ;;  %v60_v61 = vrot.slane %v576_v24, 2 }
  0xff   :  { %v163_v59 = vmul.f32 %v162_v3, %v160_v2  ;;  %v259_v6 = vshrl.u32 %v241_v42, %v257_v43  ;;  %v262_v54 = vadd.s32 127, %v261_v63  ;;  %v340_v3 = vpop.permute.xlu1 %339 }
 0x101   :  { %v164_v1 = vxor.u32 2147483648, %v163_v59  ;;  %v260_v10 = vor.u32 %v259_v6, %v258_v5  ;;  %v263_v11 = vshll.u32 %v262_v54, 23  ;;  %v62_v6 = vmul.f32 %v60_v61, %v576_v24 }
 0x103   :  { %v165_v7 = vsel %vm82_vm3, %v164_v1, %v163_v59  ;;  %v264_v56 = vor.u32 4788187, %v263_v11  ;;  %v267_v14 = vcvt.s32.f32 %v260_v10  ;;  %v294_v59 = vmul.f32 0.041666668, %v586_v30 }
 0x104   :  { %v168_v9 = vsel %vm81_vm5, %v612_v36, %v165_v7 }
 0x105   :  { %438 = vcosq.f32 %v168_v9  ;;  %v265_v13 = vand.u32 2147483647, %v264_v56  ;;  %v295_v1 = vsub.f32 0.5, %v294_v59 }
 0x106   :  { %440 = vsinq.f32 %v168_v9 }
 0x107   :  { %v268_v17 = vmul.f32 %v267_v14, %v265_v13  ;;  %442 = vrcp.f32 %v612_v36  ;;  %v335_v36 = vmul.f32 %v573_v20, %v573_v20  ;;  %v59_v20 = vmul.f32 %v57_v58, %v576_v24 }
 0x109   :  { %v269_v19 = vxor.u32 2147483648, %v268_v17  ;;  %v336_v0 = vmul.f32 -0.5, %v335_v36  ;;  %v322_v54 = vrot.slane %v59_v20, 1 }
 0x10b   :  { %v270_v16 = vsel %vm187_vm6, %v269_v19, %v268_v17  ;;  %v342_v43 = vsub.f32 %v336_v0, %v340_v3 }
 0x10c   :  { %v273_v25 = vsel %vm672_vm7, %v617_v39, %v270_v16  ;;  %v302_v39 = vrot.slane %v581_v28, 1 }
 0x10d   :  { %444 = vcosq.f32 %v273_v25  ;;  %v407_v9 = vadd.f32 -0.9189385, %v342_v43 }
 0x10e   :  { %446 = vsinq.f32 %v273_v25 }
 0x10f   :  { %v439_v23 = vpop.eup %438  ;;  %448 = vrcp.f32 %v79_v49 }
 0x110   :  { %v441_v26 = vpop.eup %440  ;;  %v180_v27 = vxor.u32 2147483648, %v439_v23 }
 0x111   :  { %v177_v31 = vxor.u32 2147483648, %v441_v26  ;;  %v443_v45 = vpop.eup %442 }
 0x112   :  { %v181_v44 = vsel %vm179_vm8, %v180_v27, %v441_v26 }
 0x113   :  { %v178_v38 = vsel %vm176_vm9, %v439_v23, %v177_v31 }
 0x114   :  { %v182_v40 = vsel %vm175_vm10, %v178_v38, %v181_v44 }
 0x115   :  { %v183_v46 = vsel %vm172_vm11, nan, %v182_v40 }
 0x116   :  { %v292_v48 = vmul.f32 %v443_v45, %v183_v46 }
 0x117   :  { %v445_v51 = vpop.eup %444 }
 0x118   :  { %v293_v50 = vsel %vm77_vm4, %v290_v47, %v292_v48  ;;  %v447_v52 = vpop.eup %446  ;;  %v285_v53 = vxor.u32 2147483648, %v445_v51 }
 0x119   :  { %v282_v55 = vxor.u32 2147483648, %v447_v52  ;;  %v449_v63 = vpop.eup %448  ;;  %v308_v8 = vmul.f32 %v293_v50, %v60_v61  ;;  %v312_v30 = vmul.f32 %v293_v50, %v57_v58  ;;  %v325_v14 = vmul.f32 %v293_v50, %v576_v24 }
 0x11a   :  { %v286_v57 = vsel %vm284_vm12, %v285_v53, %v447_v52  ;;  %v345_v24 = vrot.slane %v407_v9, 1 }
 0x11b   :  { %v283_v60 = vsel %vm281_vm13, %v445_v51, %v282_v55 }
 0x11c   :  { %v287_v62 = vsel %vm280_vm14, %v283_v60, %v286_v57 }
 0x11d   :  { %v288_v2 = vsel %vm277_vm15, nan, %v287_v62 }
 0x11e   :  { %v296_v4 = vmul.f32 2.0, %v288_v2 }
 0x120   :  { %v297_v42 = vmul.f32 %v296_v4, %v288_v2 }
 0x122   :  { %v299_v5 = vmul.f32 %v449_v63, %v297_v42 }
 0x124   :  { %v300_v7 = vsel %vm77_vm4, %v295_v1, %v299_v5 }
 0x125   :  { %v304_v10 = vmul.f32 %v302_v39, %v300_v7  ;;  %v307_v11 = vmul.f32 %v300_v7, %v59_v20  ;;  %v311_v12 = vmul.f32 %v300_v7, %v62_v6  ;;  %v318_v56 = vmul.f32 %v583_v29, %v300_v7 }
 0x126   :  { %v324_v13 = vmul.f32 %v322_v54, %v300_v7  ;;  %v332_v15 = vmul.f32 %v300_v7, %v581_v28  ;;  %v351_v17 = vmul.f32 2.0, %v300_v7 }
 0x127   :  { %v305_v18 = vsub.f32 1.0, %v304_v10  ;;  %v309_v19 = vsub.f32 %v307_v11, %v308_v8  ;;  %v313_v35 = vadd.f32 %v312_v30, %v311_v12  ;;  %v315_v21 = vadd.f32 %v308_v8, %v307_v11 }
 0x128   :  { %v319_v37 = vsub.f32 1.0, %v318_v56  ;;  %v326_v16 = vsub.f32 %v324_v13, %v325_v14  ;;  %v328_v22 = vsub.f32 %v311_v12, %v312_v30  ;;  %v330_v23 = vadd.f32 %v325_v14, %v324_v13 }
 0x129   :  { %306 = vst [vmem:[#allocation4] sm:$0x1] %v305_v18  ;;  %310 = vst [vmem:[#allocation4 + $0x1] sm:$0x1] %v309_v19  ;;  %v333_v29 = vsub.f32 1.0, %v332_v15  ;;  %450 = vlog2.f32 %v351_v17 }
 0x12a   :  { %314 = vst [vmem:[#allocation4 + $0x2] sm:$0x1] %v313_v35  ;;  %316 = vst [vmem:[#allocation4 + $0x3] sm:$0x1] %v315_v21 }
 0x12b   :  { %320 = vst [vmem:[#allocation4 + $0x4] sm:$0x1] %v319_v37  ;;  %327 = vst [vmem:[#allocation4 + $0x5] sm:$0x1] %v326_v16 }
 0x12c   :  { %329 = vst [vmem:[#allocation4 + $0x6] sm:$0x1] %v328_v22  ;;  %331 = vst [vmem:[#allocation4 + $0x7] sm:$0x1] %v330_v23 }
 0x12d   :  { %334 = vst [vmem:[#allocation4 + $0x8] sm:$0x1] %v333_v29 }
 0x12e   :  { %485 = shalt.err (!%p482_p12)
}
 0x12f   :  { %s486_s12 = scalar_lea.hbm %s730_s4, 256 }
 0x130   :  { %p487_p13 = scmp.ne.s32.totalorder %s730_s4, %s486_s12  ;;  %p490_p0 = scmp.lt.u32.totalorder %s486_s12, %s730_s4 }
 0x132   :  { %p492_p1 = pnand %p490_p0, %p487_p13 }
 0x134   :  { %495 = shalt.err (!%p492_p1)
}
 0x135   :  { %s531_s17 = smov 128   ;;  %s532_s18 = smov 8   ;;  %v347_v28 = vadd.f32 %v407_v9, %v345_v24  ;;  %v348_v25 = vrot.slane %v407_v9, 2  ;;  %v451_v26 = vpop.eup %450 }
 0x136   :  { %377 = dma.vmem_to_hbm [thread:$0]  %s372_s8, 256, %s730_s4, [#allocation5], %s531_s17, %s531_s17, %s532_s18   ;;  %v353_v31 = vmul.f32 0.6931472, %v451_v26 }
 0x137   :  { %s533_s20 = smov [#allocation6]   ;;  %v350_v27 = vadd.f32 %v348_v25, %v347_v28 }
 0x138   :  { %s384_s21 = sshll.u32 %s533_s20, 4  ;;  %s385_s21 = int_to_ptr.vmem [resolvable:$true] %s384_s21 }
 0x139   :  { %v354_v33 = vsub.f32 %v350_v27, %v353_v31  ;;  %s496_s22 = scalar_lea.vmem %s385_s21, 16  ;;  %s500_s0 = scalar_lea.vmem %s385_s21, 32 }
 0x13a   :  { %p497_p2 = scmp.ne.s32.totalorder %s385_s21, %s496_s22  ;;  %p501_p3 = scmp.lt.s32.totalorder %s385_s21, %s385_s21 }
 0x13b   :  { %355 = vst [vmem:[#allocation6] sm:$0x1] %v354_v33  ;;  %p502_p4 = scmp.lt.s32.totalorder %s500_s0, %s496_s22 }
 0x13d   :  { %p503_p5 = por %p502_p4, %p501_p3 }
 0x13f   :  { %p504_p6 = pnand %p503_p5, %p497_p2 }
 0x141   :  { %507 = shalt.err (!%p504_p6)
}
 0x142   :  { %s508_s23 = scalar_lea.hbm %s731_s5, 16 }
 0x143   :  { %p509_p7 = scmp.ne.s32.totalorder %s731_s5, %s508_s23  ;;  %p512_p8 = scmp.lt.u32.totalorder %s508_s23, %s731_s5 }
 0x145   :  { %p514_p9 = pnand %p512_p8, %p509_p7 }
 0x147   :  { %517 = shalt.err (!%p514_p9)
}
 0x148   :  { %387 = dma.vmem_to_hbm [thread:$0]  %s385_s21, 16, %s731_s5, [#allocation5]  }
 0x149   :  { %518 = dma.done.wait [#allocation3], 64  }
 0x14a   :  { %519 = vsyncadd [#allocation3], 4294967232 }
 0x14b   :  { %520 = dma.done.wait [#allocation5], 272  }
 0x14c   :  { %521 = vsyncadd [#allocation5], 4294967024 }
 0x14d   :  { %397 = vsyncpa [#allocation3], 1 }
 0x14e   :  { %398 = vsyncpa [#allocation5], 1 }

</bundles_post_ra>
